<compile_context>
chip_gen: v7x
topology: tpu7x:2x2x1
jax: 0.10.0
libtpu: 0.0.40
codegen_flags: <defaults>
</compile_context>

<pallas_src>
import jax
import jax.numpy as jnp
from jax.experimental import pallas as pl
from jax.experimental.pallas import tpu as pltpu

_MIB = 1 << 20
_VMEM_BUDGET = 40 * _MIB       # proj working-set ceiling (safe under v7x 64 MiB)
_NOPROJ_BUDGET = 32 * _MIB     # mem-bound column-scale working-set ceiling
_DEFAULT_SCOPED = 12 * _MIB    # below every generation's default scoped VMEM


def _round_up(n, m):
    return ((n + m - 1) // m) * m


def _sublane_pack(dtype):
    # native sublane packing: f32 -> 8, bf16 -> 16, int8/fp8 -> 32
    return max(8, 32 // jnp.dtype(dtype).itemsize)


def _largest_divisor_tile(dp, max_tile):
    """Largest multiple of 128 <= max_tile that divides dp (dp % 128 == 0)."""
    best = 128
    t = 128
    upper = min(max_tile, dp)
    while t <= upper:
        if dp % t == 0:
            best = t
        t += 128
    return best


def _pick_row_tile(m, pack, want):
    """Row tile: multiple of `pack`, <= want, >= 2 row tiles when possible."""
    tm = min(_round_up(want, pack), _round_up(m, pack))
    tm = max(pack, tm)
    if m > pack and _round_up(m, tm) // tm < 2:
        # cap so at least 2 row tiles exist (v7x megacore sharding).
        tm = max(pack, _round_up(-(-m // 2), pack))
    return tm


def _compiler_params(need_bytes, semantics):
    # Raise the scoped-VMEM limit only when the working set needs it (v5e's
    # default is 16 MiB); cap well under v7x's 64 MiB physical VMEM.
    vmem = None if need_bytes <= _DEFAULT_SCOPED else int(need_bytes + 8 * _MIB)
    return pltpu.CompilerParams(dimension_semantics=semantics,
                                vmem_limit_bytes=vmem)


# ----------------------------- kernels --------------------------------------

def _matmul_full_k_kernel(x_ref, w_ref, o_ref):
    # Schedules A and B: one full-K MXU matmul, f32 accumulation inside the MXU,
    # no accumulator scratch, no read-modify-write of the output tile.
    o_ref[...] = jnp.dot(x_ref[...], w_ref[...],
                         preferred_element_type=jnp.float32).astype(o_ref.dtype)


def _matmul_tiled_k_kernel(x_ref, w_ref, o_ref, acc_ref):
    # Schedule C (very large D only): k-last reduction with f32 VMEM accumulator.
    @pl.when(pl.program_id(2) == 0)
    def _():
        acc_ref[...] = jnp.zeros_like(acc_ref)

    acc_ref[...] += jnp.dot(x_ref[...], w_ref[...],
                            preferred_element_type=jnp.float32)

    @pl.when(pl.program_id(2) == pl.num_programs(2) - 1)
    def _():
        o_ref[...] = acc_ref[...].astype(o_ref.dtype)


def _colscale_kernel(x_ref, d_ref, o_ref):
    # x_ref: (tm, dn); d_ref: (1, dn) broadcasts over rows.
    o_ref[...] = (x_ref[...] * d_ref[...]).astype(o_ref.dtype)


# ----------------------------- planning -------------------------------------

def _plan_proj(m, d, itemsize, pack):
    dp128 = _round_up(d, 128)
    tm = _pick_row_tile(m, pack, 512 if m >= 512 else 256)

    # ---- Schedule A: W fully resident in VMEM -------------------------------
    w_bytes = 2 * dp128 * dp128 * itemsize            # conservative: 2 buffers
    xo_bytes = lambda t: 4 * t * dp128 * itemsize     # x + out, double buffered
    if w_bytes + xo_bytes(min(tm, 256)) <= _VMEM_BUDGET:
        while w_bytes + xo_bytes(tm) > _VMEM_BUDGET and tm > 256:
            tm = max(256, _round_up(tm // 2, pack))
        return {"kind": "A", "Dp": dp128, "tm": tm,
                "need": w_bytes + xo_bytes(tm)}

    # ---- Schedule B: full-K / tile-N (no reduction axis, no accumulator) ----
    # Pad D to a multiple of 256 so tn never collapses to 128 (MXU underfill).
    dp = _round_up(d, 256) if d > 128 else dp128

    def need_b(t_m, t_n):
        return 2 * itemsize * (t_m * dp + dp * t_n + t_m * t_n)

    for t_m in sorted({tm, 256, 128, pack}, reverse=True):
        if t_m > tm:
            continue
        for t_n in (512, 384, 256, 128):
            if dp % t_n == 0 and need_b(t_m, t_n) <= _VMEM_BUDGET:
                return {"kind": "B", "Dp": dp, "tm": t_m, "tn": t_n,
                        "need": need_b(t_m, t_n)}

    # ---- Schedule C: tiled-K fallback (astronomically large D) --------------
    tk = tn = _largest_divisor_tile(dp, 512)
    tm_c = min(tm, 256)
    need = 2 * itemsize * (tm_c * tk + tk * tn + tm_c * tn) + 4 * tm_c * tn
    return {"kind": "C", "Dp": dp, "tm": tm_c, "tk": tk, "tn": tn, "need": need}


def _plan_noproj(m, d, itemsize, pack):
    dp = _round_up(d, 128)
    dn = dp
    # If even a single pack-row strip of the full width blows the budget,
    # tile the feature dim as well.
    if 5 * pack * dn * itemsize > _NOPROJ_BUDGET:
        max_dn = max(128, (_NOPROJ_BUDGET // (5 * pack * itemsize)) // 128 * 128)
        dn = _largest_divisor_tile(dp, max_dn)
    tm = _NOPROJ_BUDGET // (5 * dn * itemsize)          # 2 in + 2 out bufs + diag
    tm = max(pack, min(1024, (tm // pack) * pack))
    tm = min(tm, _round_up(m, pack))
    if m > pack and _round_up(m, tm) // tm < 2:
        tm = max(pack, _round_up(-(-m // 2), pack))
    need = (4 * tm * dn + 2 * dn) * itemsize
    return {"Dp": dp, "dn": dn, "tm": tm, "need": need}


# ----------------------------- public API -----------------------------------

def precompute_symmetric_weight(Q, diag, dtype=None):
    """Fold ((. @ Q) * diag) @ Q.T into one weight W = (Q * diag) @ Q.T (exact).

    Compute this ONCE (at parameter init / outside the per-step jit) and pass
    it to symmetric_linear(..., W=W) so the D^3 fold is not paid every call.
    """
    W = jnp.dot(Q * diag[None, :], Q.T, preferred_element_type=jnp.float32)
    return W.astype(dtype if dtype is not None else Q.dtype)


def symmetric_linear(x, Q=None, diag=None, *, proj=True, W=None):
    """Pallas implementation of SymmetricLinear.forward.

    x    : (..., D)
    Q    : (D, D)   (proj=True; unused if a precomputed W is supplied)
    diag : (D,)
    W    : optional cached (Q * diag) @ Q.T from precompute_symmetric_weight.
    """
    orig_shape = x.shape
    D = x.shape[-1]
    x2 = x.reshape(-1, D)
    M = x2.shape[0]
    itemsize = jnp.dtype(x.dtype).itemsize
    pack = _sublane_pack(x.dtype)

    if proj:
        if W is None:
            # NOTE: callers should cache this (D^3 FLOPs) — see precompute_symmetric_weight.
            W = precompute_symmetric_weight(Q, diag, dtype=x.dtype)
        W = W.astype(x.dtype)

        plan = _plan_proj(M, D, itemsize, pack)
        Dp, tm = plan["Dp"], plan["tm"]
        Mp = _round_up(M, tm)

        x2p = x2 if (Mp == M and Dp == D) else jnp.pad(x2, ((0, Mp - M), (0, Dp - D)))
        Wp = W if Dp == D else jnp.pad(W, ((0, Dp - D), (0, Dp - D)))

        cost = pl.CostEstimate(flops=2 * Mp * Dp * Dp, transcendentals=0,
                               bytes_accessed=(2 * Mp * Dp + Dp * Dp) * itemsize)

        if plan["kind"] == "A":
            # W resident in VMEM: fetched once, every row tile is one full-K dot.
            grid = (Mp // tm,)
            y2p = pl.pallas_call(
                _matmul_full_k_kernel,
                out_shape=jax.ShapeDtypeStruct((Mp, Dp), x.dtype),
                grid_spec=pltpu.PrefetchScalarGridSpec(
                    num_scalar_prefetch=0, grid=grid,
                    in_specs=[
                        pl.BlockSpec((tm, Dp), lambda i: (i, 0)),
                        pl.BlockSpec((Dp, Dp), lambda i: (0, 0)),  # constant -> DMA'd once
                    ],
                    out_specs=pl.BlockSpec((tm, Dp), lambda i: (i, 0)),
                ),
                compiler_params=_compiler_params(plan["need"], ("parallel",)),
                cost_estimate=cost,
            )(x2p, Wp)
        elif plan["kind"] == "B":
            # Full-K / tile-N: no reduction axis, no accumulator RMW,
            # x streamed from HBM exactly once.
            tn = plan["tn"]
            grid = (Mp // tm, Dp // tn)
            y2p = pl.pallas_call(
                _matmul_full_k_kernel,
                out_shape=jax.ShapeDtypeStruct((Mp, Dp), x.dtype),
                grid_spec=pltpu.PrefetchScalarGridSpec(
                    num_scalar_prefetch=0, grid=grid,
                    in_specs=[
                        pl.BlockSpec((tm, Dp), lambda i, j: (i, 0)),
                        pl.BlockSpec((Dp, tn), lambda i, j: (0, j)),
                    ],
                    out_specs=pl.BlockSpec((tm, tn), lambda i, j: (i, j)),
                ),
                compiler_params=_compiler_params(plan["need"],
                                                 ("parallel", "parallel")),
                cost_estimate=cost,
            )(x2p, Wp)
        else:
            # Schedule C: tiled-K with f32 accumulator (very large D only).
            tk, tn = plan["tk"], plan["tn"]
            grid = (Mp // tm, Dp // tn, Dp // tk)
            y2p = pl.pallas_call(
                _matmul_tiled_k_kernel,
                out_shape=jax.ShapeDtypeStruct((Mp, Dp), x.dtype),
                grid_spec=pltpu.PrefetchScalarGridSpec(
                    num_scalar_prefetch=0, grid=grid,
                    in_specs=[
                        pl.BlockSpec((tm, tk), lambda i, j, k: (i, k)),
                        pl.BlockSpec((tk, tn), lambda i, j, k: (k, j)),
                    ],
                    out_specs=pl.BlockSpec((tm, tn), lambda i, j, k: (i, j)),
                    scratch_shapes=[pltpu.VMEM((tm, tn), jnp.float32)],
                ),
                compiler_params=_compiler_params(
                    plan["need"], ("parallel", "parallel", "arbitrary")),
                cost_estimate=cost,
            )(x2p, Wp)
    else:
        # Pure memory-bound column scale, budget-tiled so it never exceeds
        # v7x's 64 MiB VMEM even for very large D.
        plan = _plan_noproj(M, D, itemsize, pack)
        Dp, dn, tm = plan["Dp"], plan["dn"], plan["tm"]
        Mp = _round_up(M, tm)

        x2p = x2 if (Mp == M and Dp == D) else jnp.pad(x2, ((0, Mp - M), (0, Dp - D)))
        d2p = diag.reshape(1, D).astype(x.dtype)
        if Dp != D:
            d2p = jnp.pad(d2p, ((0, 0), (0, Dp - D)))

        cost = pl.CostEstimate(flops=Mp * Dp, transcendentals=0,
                               bytes_accessed=2 * Mp * Dp * itemsize)

        if dn == Dp:
            grid = (Mp // tm,)
            in_specs = [pl.BlockSpec((tm, Dp), lambda i: (i, 0)),
                        pl.BlockSpec((1, Dp), lambda i: (0, 0))]
            out_specs = pl.BlockSpec((tm, Dp), lambda i: (i, 0))
            semantics = ("parallel",)
        else:
            grid = (Mp // tm, Dp // dn)
            in_specs = [pl.BlockSpec((tm, dn), lambda i, j: (i, j)),
                        pl.BlockSpec((1, dn), lambda i, j: (0, j))]
            out_specs = pl.BlockSpec((tm, dn), lambda i, j: (i, j))
            semantics = ("parallel", "parallel")

        y2p = pl.pallas_call(
            _colscale_kernel,
            out_shape=jax.ShapeDtypeStruct((Mp, Dp), x.dtype),
            grid_spec=pltpu.PrefetchScalarGridSpec(
                num_scalar_prefetch=0, grid=grid,
                in_specs=in_specs, out_specs=out_specs,
            ),
            compiler_params=_compiler_params(plan["need"], semantics),
            cost_estimate=cost,
        )(x2p, d2p)

    if Mp != M or Dp != D:
        y2p = y2p[:M, :D]
    return y2p.reshape(orig_shape)


if __name__ == "__main__":
    # Small shapes consistent with the module: batch=2, seq=8, hidden(in_out_dim)=32
    batch, seq, hidden = 2, 8, 32
    key = jax.random.PRNGKey(0)
    kx, kq, kd = jax.random.split(key, 3)

    stdv = 1.0 / (hidden ** 0.5)
    # Deterministic parameter init matching nn.init.uniform_(-stdv, stdv)
    Q = jax.random.uniform(kq, (hidden, hidden), jnp.float32, -stdv, stdv)
    diag = jax.random.uniform(kd, (hidden,), jnp.float32, -stdv, stdv)
    x = jax.random.normal(kx, (batch, seq, hidden), jnp.float32)

    # proj=True with a cached folded weight (the recommended usage):
    W = jax.block_until_ready(precompute_symmetric_weight(Q, diag, dtype=x.dtype))
    y = symmetric_linear(x, Q, diag, proj=True, W=W)
    jax.block_until_ready(y)
    y_ref = ((x @ Q) * diag) @ Q.T
    assert jnp.allclose(y, y_ref, atol=1e-4, rtol=1e-4), "proj=True mismatch"

    # proj=True without a cached W (wrapper folds it once) — same result.
    y_nc = symmetric_linear(x, Q, diag, proj=True)
    jax.block_until_ready(y_nc)
    assert jnp.allclose(y_nc, y_ref, atol=1e-4, rtol=1e-4), "proj=True (no cache) mismatch"

    # proj=False: elementwise column scale.
    y2 = symmetric_linear(x, Q, diag, proj=False)
    jax.block_until_ready(y2)
    assert jnp.allclose(y2, x * diag, atol=1e-6, rtol=1e-6), "proj=False mismatch"

    print("KERNEL_OK")
</pallas_src>

<mosaic_0001>
module attributes {stable_mosaic.version = 11 : i64} {
  func.func @_matmul_full_k_kernel(%arg0: i32, %arg1: memref<8x128xf32, #tpu.memory_space<vmem>>, %arg2: memref<128x128xf32, #tpu.memory_space<vmem>>, %arg3: memref<8x128xf32, #tpu.memory_space<vmem>>) attributes {dimension_semantics = [#tpu.dimension_semantics<parallel>], iteration_bounds = array<i64: 2>, scalar_prefetch = 0 : i64, scratch_operands = 0 : i64, tpu.core_type = #tpu.core_type<tc>, window_params = [{transform_indices = @transform_0, window_bounds = array<i64: 8, 128>}, {pipeline_mode = #tpu.pipeline_mode<synchronous>, transform_indices = @transform_1, window_bounds = array<i64: 128, 128>}, {transform_indices = @transform_2, window_bounds = array<i64: 8, 128>}]} {
    %c0 = arith.constant 0 : index
    %c0_0 = arith.constant 0 : index
    %0 = vector.load %arg1[%c0, %c0_0] : memref<8x128xf32, #tpu.memory_space<vmem>>, vector<8x128xf32>
    %c0_1 = arith.constant 0 : index
    %c0_2 = arith.constant 0 : index
    %1 = vector.load %arg2[%c0_1, %c0_2] : memref<128x128xf32, #tpu.memory_space<vmem>>, vector<128x128xf32>
    %cst = arith.constant dense<0.000000e+00> : vector<8x128xf32>
    %2 = tpu.matmul %0, %1, %cst {dimension_numbers = #tpu.dot_dimension_numbers<[1], [0], [0], [1], [0, 0, 1, 1], [], []>} : vector<8x128xf32>, vector<128x128xf32>, vector<8x128xf32> -> vector<8x128xf32>
    %c0_3 = arith.constant 0 : index
    %c0_4 = arith.constant 0 : index
    %3 = vector.load %arg3[%c0_3, %c0_4] : memref<8x128xf32, #tpu.memory_space<vmem>>, vector<8x128xf32>
    tpu.vector_store %arg3[%c0_3, %c0_4], %2 {strides = array<i32>} : memref<8x128xf32, #tpu.memory_space<vmem>>, vector<8x128xf32>,
    return
  }
  func.func @transform_0(%arg0: i32) -> (i32, i32) {
    %c0_i32 = arith.constant 0 : i32
    %c0_i32_0 = arith.constant 0 : i32
    return %arg0, %c0_i32 : i32, i32
  }
  func.func @transform_1(%arg0: i32) -> (i32, i32) {
    %c0_i32 = arith.constant 0 : i32
    %c0_i32_0 = arith.constant 0 : i32
    %c0_i32_1 = arith.constant 0 : i32
    return %c0_i32, %c0_i32_0 : i32, i32
  }
  func.func @transform_2(%arg0: i32) -> (i32, i32) {
    %c0_i32 = arith.constant 0 : i32
    %c0_i32_0 = arith.constant 0 : i32
    return %arg0, %c0_i32 : i32, i32
  }
}

</mosaic_0001>

<bundles_post_ra>
// kernel: tpu_custom_call.1
= control target key start
LH: loop header
LB: loop body
LE: loop exit
PB: predicated region body
PF: predicated region fallthrough
CT: control target
= control target key end

     0   :  { %7 = vsyncpa [#allocation3], 0  ;;  %s864_s0 = inlined_call_operand.hbm [shape: f32[16,128], index: 0, kind: input, shape index: {}]   ;;  %s865_s1 = inlined_call_operand.hbm [shape: f32[128,128], index: 1, kind: input, shape index: {}]   ;;  %s866_s2 = inlined_call_operand.hbm [shape: f32[16,128], index: 2, kind: output, shape index: {}]  }
   0x1   :  { %9 = vsyncpa [#allocation3 + $0x1], 0 }
   0x2   :  { %10 = vsyncpa [#allocation6], 0 }
   0x3   :  { %11 = vsyncpa [#allocation4], 0 }
   0x4   :  { %13 = vsyncpa [#allocation4 + $0x1], 0  ;;  %s661_s9 = smov 0   ;;  %s663_s10 = smov 0  }
   0x5   :  { %s665_s11 = smov 0   ;;  %s667_s12 = smov 0  }
   0x6 LB: > { %s682_s13 = sadd.s32 4294967295, %s636_s12   ;;  %s356_s14 = sadd.s32 4294967294, %s636_s12   ;;  %s636_s12 = sphi %s667_s12, %s886_s12   ;;  %s632_s11 = sphi %s665_s11, %s885_s11   ;;  %s628_s10 = sphi %s663_s10, %s884_s10   ;;  %s624_s9 = sphi %s661_s9, %s883_s9  }
   0x7   : > { %p39_p0 = scmp.ne.s32.totalorder %s628_s10, %s624_s9  ;;  %p867_p1 = scmp.eq.s32.totalorder %s682_s13, 0 }
   0x8   : > { %p90_p3 = scmp.eq.s32.totalorder %s356_s14, 1  ;;  %p357_p5 = scmp.ge.s32.totalorder %s636_s12, 1 }
   0x9   : > { %p691_p4 = por %p867_p1, %p39_p0  ;;  %p97_p7 = scmp.lt.s32.totalorder %s636_s12, 3 }
   0xa   : > { %p696_p6 = por %p90_p3, %p39_p0  ;;  %s638_s18 = smov [#allocation5]  }
   0xb   : > { %s870_s15 = scalar_select %p691_p4, 1, 0 }
   0xc   : > { %s871_s16 = scalar_select %p696_p6, 1, 0 }
   0xd   : > { %p701_p8 = pnand %p357_p5, %p97_p7  ;;  %s109_s19 = sshll.u32 %s638_s18, 4  ;;  %s705_s19 = int_to_ptr.vmem [resolvable:$true] %s109_s19 }
   0xe   : > { %s717_s21 = sadd.s32 1, %s636_s12   ;;  %s26_s22 = sadd.s32 1, %s632_s11 }
   0xf   : > { %s872_s17 = scalar_select %p701_p8, 1, 0 }
  0x10   : > { %p454_p9 = pneg %p701_p8  ;;  %s23_s23 = ssub.s32 %s636_s12, %s717_s21 }
  0x11   : > { %s508_s26 = scalar_lea.hbm %s865_s1, 2048 }
  0x12   : > { %p712_p11 = pnand %p454_p9, %p867_p1  ;;  %p509_p12 = scmp.ne.s32.totalorder %s865_s1, %s508_s26 }
  0x13   : > { %p515_p5 = scmp.lt.u32.totalorder %s508_s26, %s865_s1 }
  0x14   : > { %p510_p13 = pneg %p712_p11 }
  0x16   : > { %p511_p0 = pnand %p510_p13, %p509_p12 }
  0x18   : > { %p512_p3 = pneg %p511_p0 }
  0x1a   : > { %p517_p7 = pnand %p515_p5, %p512_p3 }
  0x1c   : > { %520 = shalt.err (!%p517_p7)
}
  0x1d   : > { %s521_s3 = scalar_lea.vmem %s705_s19, 2048  ;;  %p529_p2 = scmp.lt.s32.totalorder %s705_s19, %s705_s19 }
  0x1e   : > { %p522_p9 = scmp.ne.s32.totalorder %s705_s19, %s521_s3  ;;  %p530_p6 = scmp.lt.s32.totalorder %s521_s3, %s521_s3 }
  0x20   : > { %p524_p10 = pnand %p522_p9, %p510_p13  ;;  %p531_p4 = por %p530_p6, %p529_p2 }
  0x22   : > { %p525_p1 = pneg %p524_p10 }
  0x24   : > { %p532_p8 = pnand %p531_p4, %p525_p1 }
  0x26   : > { %535 = shalt.err (!%p532_p8)
}
  0x27   : > { %s639_s4 = smov 128   ;;  %s640_s5 = smov 8  }
  0x28   : > { %457 = dma.hbm_to_vmem [thread:$0]  (!%p712_p11), %s865_s1, 2048, %s705_s19, [#allocation6], %s639_s4, %s639_s4, %s640_s5  }
  0x29   : > { %p24_p2 = scmp.eq.s32.totalorder %s23_s23, 0  ;;  %p33_p1 = scmp.ne.s32.totalorder %s632_s11, %s628_s10 }
  0x2a   : > { %p34_p4 = scmp.eq.s32.totalorder %s636_s12, 0  ;;  %p467_p6 = scmp.lt.s32.totalorder %s636_s12, 2 }
  0x2b   : > { %s748_s8 = scalar_select %p24_p2, %s632_s11, %s26_s22  }
  0x2c   : > { %p35_p8 = por %p34_p4, %p33_p1  ;;  %p874_p10 = scmp.eq.s32.totalorder %s682_s13, 1 }
  0x2d   : > { %s123_s18 = sand.u32 1, %s632_s11   ;;  %s361_s24 = sshll.u32 %s636_s12, 7 }
  0x2e   : > { %p752_p12 = por %p874_p10, %p33_p1  ;;  %s360_s25 = sshll.u32 %s123_s18, 3 }
  0x2f   : > { %s761_s27 = scalar_lea.hbm %s864_s0, %s361_s24  ;;  %s127_s19 = scalar_lea.vmem [#allocation2], %s360_s25 }
  0x30   : > { %s134_s22 = sshll.u32 %s127_s19, 4  ;;  %p763_p11 = pnand %p467_p6, %p35_p8  ;;  %s767_s22 = int_to_ptr.vmem [resolvable:$true] %s134_s22 }
  0x31   : > { %s124_s28 = scalar_lea.sflag [#allocation3], %s123_s18  ;;  %s536_s29 = scalar_lea.hbm %s761_s27, 128 }
  0x32   : > { %p537_p13 = scmp.ne.s32.totalorder %s761_s27, %s536_s29  ;;  %p538_p0 = pneg %p763_p11 }
  0x33   : > { %s541_s4 = scalar_lea.hbm %s864_s0, 256  ;;  %p542_p7 = scmp.lt.u32.totalorder %s761_s27, %s864_s0 }
  0x34   : > { %p539_p3 = pnand %p538_p0, %p537_p13  ;;  %p543_p9 = scmp.lt.u32.totalorder %s541_s4, %s536_s29 }
  0x35   : > { %p545_p1 = scmp.lt.u32.totalorder %s536_s29, %s761_s27 }
  0x36   : > { %p540_p5 = pneg %p539_p3  ;;  %p544_p2 = por %p543_p9, %p542_p7 }
  0x38   : > { %p546_p4 = por %p545_p1, %p544_p2 }
  0x3a   : > { %p547_p6 = pnand %p546_p4, %p540_p5 }
  0x3c   : > { %550 = shalt.err (!%p547_p6)
}
  0x3d   : > { %s551_s7 = scalar_lea.vmem %s767_s22, 128  ;;  %s641_s18 = smov [#allocation2]  }
  0x3e   : > { %p552_p8 = scmp.ne.s32.totalorder %s767_s22, %s551_s7  ;;  %s556_s24 = sshll.u32 %s641_s18, 4  ;;  %s557_s24 = int_to_ptr.vmem [resolvable:$false] %s556_s24 }
  0x3f   : > { %s558_s25 = scalar_lea.vmem %s557_s24, 256  ;;  %p559_p3 = scmp.lt.s32.totalorder %s767_s22, %s557_s24 }
  0x40   : > { %p554_p10 = pnand %p552_p8, %p538_p0  ;;  %p560_p7 = scmp.lt.s32.totalorder %s558_s25, %s551_s7 }
  0x42   : > { %p555_p13 = pneg %p554_p10  ;;  %p561_p9 = por %p560_p7, %p559_p3 }
  0x44   : > { %p562_p2 = pnand %p561_p9, %p555_p13 }
  0x46   : > { %565 = shalt.err (!%p562_p2)
}
  0x47   : > { %461 = dma.hbm_to_vmem [thread:$0]  (!%p763_p11), %s761_s27, 128, %s767_s22, %s124_s28  }
  0x48   : > { %p877_p5 = scmp.ne.s32.totalorder %s872_s17, 0 }
  0x49   : > { %s797_s20 = sand.u32 (!%p877_p5), 1, %s628_s10   ;;  %p878_p0 = scmp.ne.s32.totalorder (!%p877_p5), %s870_s15, 0 }
  0x4a   : > { %143 = sbr.rel (%p877_p5) target bundleno = 345 (0x159), region = 28  ;;  %s363_s26 = sshll.u32 (!%p877_p5), %s797_s20, 3 }
  0x4b   : > { %s146_s19 = scalar_lea.sflag (!%p877_p5), [#allocation3], %s797_s20  ;;  %s803_s29 = scalar_lea.vmem (!%p877_p5), [#allocation2], %s363_s26 }
  0x51   : > { %611 = dma.done.wait (%p878_p0), %s146_s19, 128  }
  0x52   : > { %613 = vsyncadd (%p878_p0), %s146_s19, 4294967168  ;;  %p879_p11 = scmp.eq.s32.totalorder %s682_s13, 0 }
  0x54   : > { %615 = dma.done.wait (%p879_p11), [#allocation6], 2048   ;;  %p880_p1 = pmov %p879_p11 }
  0x55   : > { %v642_v0 = vmov 0.0|0.0   ;;  %vm643_vm0 = vmmov 0   ;;  %v644_v1 = vmov 0.0   ;;  %v175_v2 = vld [vmem:[#allocation5] sm:$0xff]  ;;  %v176_v3 = vld [vmem:[#allocation5 + $0x8] sm:$0xff]  ;;  %v177_v4 = vld [vmem:[#allocation5 + $0x10] sm:$0xff] }
  0x56   : > { %617 = vsyncadd (%p880_p1), [#allocation6], 4294965248  ;;  %422 = vmatprep.subr.bf16.mxu0 %v642_v0  ;;  %419 = vmatprep.mubr.msk.f32.mxu0 %vm643_vm0, %v644_v1  ;;  %v423_v5 = vpack.c.bf16 %v176_v3, %v175_v2  ;;  %v178_v6 = vld [vmem:[#allocation5 + $0x18] sm:$0xff]  ;;  %v179_v8 = vld [vmem:[#allocation5 + $0x20] sm:$0xff]  ;;  %s173_s15 = scalar_lea.vmem [#allocation7], %s363_s26  ;;  %s367_s27 = sshll.u32 %s682_s13, 7 }
  0x57   : > { %v426_v7 = vpack.c.bf16 %v178_v6, %v177_v4  ;;  %v180_v9 = vld [vmem:[#allocation5 + $0x28] sm:$0xff]  ;;  %v181_v11 = vld [vmem:[#allocation5 + $0x30] sm:$0xff]  ;;  %v182_v12 = vld [vmem:[#allocation5 + $0x38] sm:$0xff]  ;;  %s276_s17 = sshll.u32 %s173_s15, 4  ;;  %s822_s28 = scalar_lea.hbm %s866_s2, %s367_s27  ;;  %s817_s17 = int_to_ptr.vmem [resolvable:$true] %s276_s17 }
  0x58   : > { %424 = vmatpush3.bf16.msra.mxu0 %v423_v5  ;;  %v429_v10 = vpack.c.bf16 %v180_v9, %v179_v8  ;;  %v432_v13 = vpack.c.bf16 %v182_v12, %v181_v11  ;;  %v183_v14 = vld [vmem:[#allocation5 + $0x40] sm:$0xff]  ;;  %v184_v15 = vld [vmem:[#allocation5 + $0x48] sm:$0xff]  ;;  %v185_v17 = vld [vmem:[#allocation5 + $0x50] sm:$0xff]  ;;  %s263_s30 = scalar_lea.sflag [#allocation4], %s797_s20  ;;  %s566_s3 = scalar_lea.vmem %s817_s17, 128 }
  0x59   : > { %425 = vmatprep.subr.bf16.mxu0 %v642_v0  ;;  %v435_v16 = vpack.c.bf16 %v184_v15, %v183_v14  ;;  %v186_v18 = vld [vmem:[#allocation5 + $0x58] sm:$0xff]  ;;  %v187_v20 = vld [vmem:[#allocation5 + $0x60] sm:$0xff]  ;;  %v188_v21 = vld [vmem:[#allocation5 + $0x68] sm:$0xff]  ;;  %p567_p4 = scmp.ne.s32.totalorder %s817_s17, %s566_s3  ;;  %s645_s13 = smov [#allocation7]  }
  0x5a   : > { %v438_v19 = vpack.c.bf16 %v186_v18, %v185_v17  ;;  %v441_v22 = vpack.c.bf16 %v188_v21, %v187_v20  ;;  %v189_v23 = vld [vmem:[#allocation5 + $0x70] sm:$0xff]  ;;  %v190_v24 = vld [vmem:[#allocation5 + $0x78] sm:$0xff]  ;;  %s570_s4 = sshll.u32 %s645_s13, 4  ;;  %s571_s4 = int_to_ptr.vmem [resolvable:$false] %s570_s4 }
  0x5b   : > { %v444_v25 = vpack.c.bf16 %v190_v24, %v189_v23  ;;  %v174_v26 = vld [vmem:[%s803_s29] sm:$0xff]  ;;  %p568_p6 = pnand %p567_p4, %p752_p12  ;;  %s572_s5 = scalar_lea.vmem %s571_s4, 256 }
  0x5c   : > { %427 = vmatpush3.bf16.msra.mxu0 %v426_v7  ;;  %p573_p10 = scmp.lt.s32.totalorder %s817_s17, %s571_s4  ;;  %p574_p13 = scmp.lt.s32.totalorder %s572_s5, %s566_s3 }
  0x5d   : > { %428 = vmatprep.subr.bf16.mxu0 %v642_v0  ;;  %p569_p8 = pneg %p568_p6 }
  0x5e   : > { %p575_p3 = por %p574_p13, %p573_p10 }
  0x60   : > { %430 = vmatpush3.bf16.msra.mxu0 %v429_v10  ;;  %p576_p7 = pnand %p575_p3, %p569_p8 }
  0x61   : > { %431 = vmatprep.subr.bf16.mxu0 %v642_v0 }
  0x64   : > { %433 = vmatpush3.bf16.msra.mxu0 %v432_v13 }
  0x65   : > { %434 = vmatprep.subr.bf16.mxu0 %v642_v0 }
  0x68   : > { %436 = vmatpush3.bf16.msra.mxu0 %v435_v16 }
  0x69   : > { %437 = vmatprep.subr.bf16.mxu0 %v642_v0 }
  0x6c   : > { %439 = vmatpush3.bf16.msra.mxu0 %v438_v19 }
  0x6d   : > { %440 = vmatprep.subr.bf16.mxu0 %v642_v0 }
  0x70   : > { %442 = vmatpush3.bf16.msra.mxu0 %v441_v22 }
  0x71   : > { %443 = vmatprep.subr.bf16.mxu0 %v642_v0 }
  0x74   : > { %445 = vmatpush3.bf16.msra.mxu0 %v444_v25 }
  0x77   : > { %420 = vmatmul.mubr.f32.vlgmr.msra.gmra.mrb[0].mxu0 %v174_v26 }
 0x14a   : > { %v257_v27 = vpop.f32.mrb[0].mxu0 }
 0x14b   : > { %261 = vst [vmem:[%s173_s15] sm:$0xff] %v257_v27  ;;  %v421_v28 = vpop.f32.mrb[1].mxu0 }
 0x14c   : > { %579 = shalt.err (!%p576_p7)
}
 0x14d   : > { %s580_s6 = scalar_lea.hbm %s822_s28, 128  ;;  %s584_s24 = scalar_lea.hbm %s866_s2, 256 }
 0x14e   : > { %p581_p9 = scmp.ne.s32.totalorder %s822_s28, %s580_s6  ;;  %p585_p0 = scmp.lt.u32.totalorder %s822_s28, %s866_s2 }
 0x14f   : > { %p586_p11 = scmp.lt.u32.totalorder %s584_s24, %s580_s6  ;;  %p588_p4 = scmp.lt.u32.totalorder %s580_s6, %s822_s28 }
 0x150   : > { %p582_p2 = pnand %p581_p9, %p752_p12 }
 0x151   : > { %p587_p1 = por %p586_p11, %p585_p0 }
 0x152   : > { %p583_p5 = pneg %p582_p2 }
 0x153   : > { %p589_p6 = por %p588_p4, %p587_p1 }
 0x155   : > { %p590_p8 = pnand %p589_p6, %p583_p5 }
 0x157   : > { %593 = shalt.err (!%p590_p8)
}
 0x158   : > { %452 = dma.vmem_to_hbm [thread:$0]  (%p752_p12), %s817_s17, 128, %s822_s28, %s263_s30  }
 0x159 PF: > { %s288_s26 = sand.u32 1, %s624_s9   ;;  %p881_p10 = scmp.ne.s32.totalorder %s871_s16, 0 }
 0x15a   : > { %p882_p13 = scmp.ge.s32.totalorder %s636_s12, 2  ;;  %s289_s19 = scalar_lea.sflag [#allocation4], %s288_s26 }
 0x15c   : > { %p463_p3 = pnand %p882_p13, %p881_p10 }
 0x15e   : > { %619 = dma.done.wait (!%p463_p3), %s289_s19, 128  }
 0x15f   : > { %621 = vsyncadd (!%p463_p3), %s289_s19, 4294967168  ;;  %p16_p7 = scmp.ge.s32.totalorder %s717_s21, 4   ;;  %s883_s9 = smov %s628_s10 }
 0x160   : > { %s884_s10 = smov %s632_s11  ;;  %s885_s11 = smov %s748_s8 }
 0x161   : > { %s886_s12 = smov %s717_s21  ;;  %18 = sbr.rel (!%p16_p7) target bundleno = 6 (0x6), region = 77 }
 0x168   :  { %294 = vsyncpa [#allocation3], 1 }
 0x169   :  { %296 = vsyncpa [#allocation3 + $0x1], 1 }
 0x16a   :  { %297 = vsyncpa [#allocation6], 1 }
 0x16b   :  { %298 = vsyncpa [#allocation4], 1 }
 0x16c   :  { %300 = vsyncpa [#allocation4 + $0x1], 1 }

</bundles_post_ra>
